<compile_context>
chip_gen: v7x
topology: tpu7x:2x2x1
jax: 0.10.0
libtpu: 0.0.40
codegen_flags: <defaults>
</compile_context>

<pallas_src>
import jax
import jax.numpy as jnp
from jax.experimental import pallas as pl
from jax.experimental.pallas import tpu as pltpu

# ---- model hyperparameters (small, consistent with the module) ----
B, S, H = 2, 8, 32          # batch, seq, hidden_size
KD, VD = 32, 32             # total_key_depth, total_value_depth
F = 64                      # filter_size
NUM_HEADS = 4
DK = KD // NUM_HEADS
DV = VD // NUM_HEADS
QKV_D = DK + DK + DV        # fused per-head q|k|v width
BS = B * S
EPS = 1e-6
QUERY_SCALE = DK ** (-0.5)
NEG_INF = -1e30


def encoder_layer_kernel(x_ref, wm_ref, o_ref):
    """One full encoder layer, single invocation, everything in VMEM.

    x_ref  : (B*S, H)        activations (batch rows stacked)
    wm_ref : (NH, 64, 128)   packed slab: Wqkv, Wo, W1, W2, LN params, biases, mask
    o_ref  : (B*S, H)        output
    """
    bf16 = jnp.bfloat16
    x = x_ref[...]                                   # (16, 32) f32

    # ---- unpack the packed weight slab (static ref slices, no relayout) ----
    wqkv  = wm_ref[:, 0:H, 0:QKV_D]                  # (4, 32, 24) head-major Q|K|V
    wo_h  = wm_ref[:, 0:DV, 32:64]                   # (4, 8, 32)  head-major Wo
    w1    = wm_ref[0, 0:H, 64:128]                   # (32, 64)
    w2    = wm_ref[1, 0:F, 64:96]                    # (64, 32)
    g_mha = wm_ref[2, 0:1, 64:96]                    # (1, 32)
    b_mha = wm_ref[2, 1:2, 64:96]
    g_ffn = wm_ref[2, 2:3, 64:96]
    b_ffn = wm_ref[2, 3:4, 64:96]
    bf2   = wm_ref[2, 4:5, 64:96]                    # (1, 32)
    bf1   = wm_ref[2, 5:6, 64:128]                   # (1, 64)
    mask  = wm_ref[3, 0:BS, 64:64 + BS]              # (16, 16) additive block-diag mask

    def layer_norm(v, g, b):
        mean = jnp.mean(v, axis=-1, keepdims=True)
        # PyTorch .std() is unbiased -> divisor (H - 1); eps added to std.
        var = jnp.sum((v - mean) ** 2, axis=-1, keepdims=True) * (1.0 / (H - 1))
        inv = pl.reciprocal(jnp.sqrt(var) + EPS, approx=True)    # EUP
        return g * (v - mean) * inv + b

    # ---- pre-attention layer norm (f32) ----
    xn = layer_norm(x, g_mha, b_mha)                 # (16, 32)

    # ---- fused, head-batched QKV projection (bf16 operands, f32 accumulate) ----
    xb = jnp.broadcast_to(xn.astype(bf16), (NUM_HEADS, BS, H))   # (4, 16, 32)
    qkv = jnp.einsum('hnd,hdk->hnk', xb, wqkv.astype(bf16),
                     preferred_element_type=jnp.float32)         # (4, 16, 24) f32
    q = qkv[:, :, 0:DK].astype(bf16)                 # (4, 16, 8)
    k = qkv[:, :, DK:2 * DK].astype(bf16)            # (4, 16, 8)
    v = qkv[:, :, 2 * DK:2 * DK + DV].astype(bf16)   # (4, 16, 8)

    # ---- head-batched attention over stacked batches, precomputed mask ----
    logits = jnp.einsum('hqd,hkd->hqk', q, k,
                        preferred_element_type=jnp.float32)      # (4, 16, 16) f32
    logits = logits + mask[None, :, :]

    m = jnp.max(logits, axis=-1, keepdims=True)
    e = jnp.exp(logits - m)
    p = e * pl.reciprocal(jnp.sum(e, axis=-1, keepdims=True), approx=True)
    ctx = jnp.einsum('hqk,hkd->hqd', p.astype(bf16), v,
                     preferred_element_type=jnp.float32)         # (4, 16, 8) f32

    # ---- head merge on the MXU: 4 accumulating (16,8)@(8,32) matmuls ----
    wo_bf = wo_h.astype(bf16)                        # (4, 8, 32)
    attn = jnp.dot(ctx[0].astype(bf16), wo_bf[0],
                   preferred_element_type=jnp.float32)           # (16, 32) f32
    for h in range(1, NUM_HEADS):
        attn = attn + jnp.dot(ctx[h].astype(bf16), wo_bf[h],
                              preferred_element_type=jnp.float32)

    # ---- residual 1 ----
    x2 = x + attn

    # ---- pre-FFN layer norm ----
    xn2 = layer_norm(x2, g_ffn, b_ffn)

    # ---- FFN: linear -> ReLU -> linear -> ReLU (ReLU after last layer too) ----
    h1 = jnp.maximum(
        jnp.dot(xn2.astype(bf16), w1.astype(bf16),
                preferred_element_type=jnp.float32) + bf1, 0.0)
    h2 = jnp.maximum(
        jnp.dot(h1.astype(bf16), w2.astype(bf16),
                preferred_element_type=jnp.float32) + bf2, 0.0)

    # ---- residual 2 ----
    o_ref[...] = (x2 + h2).astype(o_ref.dtype)


def pack_params(params):
    """One-time repack of the 12 raw parameter arrays into a single slab."""
    (wq, wk, wv, wo, g_mha, b_mha, g_ffn, b_ffn, w1, bf1, w2, bf2) = params

    def to_heads(w, d):                              # (H, NH*d) -> (NH, H, d)
        return w.reshape(H, NUM_HEADS, d).transpose(1, 0, 2)

    # Fused head-major Q|K|V weight; query scale folded into the Q block.
    wqkv_h = jnp.concatenate(
        [to_heads(wq * QUERY_SCALE, DK), to_heads(wk, DK), to_heads(wv, DV)],
        axis=-1).astype(jnp.float32)                 # (NH, H, 24)
    wo_h = wo.reshape(NUM_HEADS, DV, H).astype(jnp.float32)     # (NH, 8, 32)

    # Precomputed additive block-diagonal mask separating the stacked batches.
    rb = jnp.arange(BS)[:, None] // S
    cb = jnp.arange(BS)[None, :] // S
    mask = jnp.where(rb == cb, 0.0, NEG_INF).astype(jnp.float32)  # (16, 16)

    # Packed (NH, 64, 128) slab holding everything (one DMA).
    wm = jnp.zeros((NUM_HEADS, 64, 128), jnp.float32)
    wm = wm.at[:, 0:H, 0:QKV_D].set(wqkv_h)          # Wqkv (4, 32, 24)
    wm = wm.at[:, 0:DV, 32:64].set(wo_h)             # Wo   (4, 8, 32)
    wm = wm.at[0, 0:H, 64:128].set(w1)               # W1   (32, 64)
    wm = wm.at[1, 0:F, 64:96].set(w2)                # W2   (64, 32)
    wm = wm.at[2, 0, 64:96].set(g_mha)
    wm = wm.at[2, 1, 64:96].set(b_mha)
    wm = wm.at[2, 2, 64:96].set(g_ffn)
    wm = wm.at[2, 3, 64:96].set(b_ffn)
    wm = wm.at[2, 4, 64:96].set(bf2)
    wm = wm.at[2, 5, 64:128].set(bf1)
    wm = wm.at[3, 0:BS, 64:64 + BS].set(mask)
    return wm


@jax.jit
def encoder_layer(x, wm):
    x2d = x.reshape(BS, H)                           # free, contiguous reshape
    out2d = pl.pallas_call(
        encoder_layer_kernel,
        out_shape=jax.ShapeDtypeStruct((BS, H), x.dtype),
        in_specs=[pl.BlockSpec(memory_space=pltpu.MemorySpace.VMEM)] * 2,
        out_specs=pl.BlockSpec(memory_space=pltpu.MemorySpace.VMEM),
    )(x2d, wm)
    return out2d.reshape(B, S, H)


def reference(x, params):
    """Pure-JAX f32 reference mirroring the PyTorch forward pass exactly."""
    (wq, wk, wv, wo, g_mha, b_mha, g_ffn, b_ffn, w1, bf1, w2, bf2) = params

    def layer_norm(v, g, b):
        mean = jnp.mean(v, axis=-1, keepdims=True)
        var = jnp.sum((v - mean) ** 2, axis=-1, keepdims=True) / (H - 1)
        return g * (v - mean) / (jnp.sqrt(var) + EPS) + b

    xn = layer_norm(x, g_mha, b_mha)
    q = (xn @ wq) * QUERY_SCALE
    k = xn @ wk
    v = xn @ wv

    def split(t, d):                                 # (B,S,D) -> (B,NH,S,d)
        return t.reshape(B, S, NUM_HEADS, d).transpose(0, 2, 1, 3)

    qh, kh, vh = split(q, DK), split(k, DK), split(v, DV)
    logits = jnp.einsum('bhqd,bhkd->bhqk', qh, kh)
    w = jax.nn.softmax(logits, axis=-1)
    ctx = jnp.einsum('bhqk,bhkd->bhqd', w, vh)
    ctx = ctx.transpose(0, 2, 1, 3).reshape(B, S, VD)
    attn_out = ctx @ wo
    x2 = x + attn_out

    xn2 = layer_norm(x2, g_ffn, b_ffn)
    h1 = jnp.maximum(xn2 @ w1 + bf1, 0.0)
    h2 = jnp.maximum(h1 @ w2 + bf2, 0.0)
    return x2 + h2


def init_params(key):
    ks = jax.random.split(key, 6)
    scale = 0.1
    wq = scale * jax.random.normal(ks[0], (H, KD), jnp.float32)
    wk = scale * jax.random.normal(ks[1], (H, KD), jnp.float32)
    wv = scale * jax.random.normal(ks[2], (H, VD), jnp.float32)
    wo = scale * jax.random.normal(ks[3], (VD, H), jnp.float32)
    g_mha = jnp.ones((H,), jnp.float32)              # LayerNorm init: ones/zeros
    b_mha = jnp.zeros((H,), jnp.float32)
    g_ffn = jnp.ones((H,), jnp.float32)
    b_ffn = jnp.zeros((H,), jnp.float32)
    w1 = scale * jax.random.normal(ks[4], (H, F), jnp.float32)
    bf1 = jnp.zeros((F,), jnp.float32)
    w2 = scale * jax.random.normal(ks[5], (F, H), jnp.float32)
    bf2 = jnp.zeros((H,), jnp.float32)
    return (wq, wk, wv, wo, g_mha, b_mha, g_ffn, b_ffn, w1, bf1, w2, bf2)


if __name__ == "__main__":
    key = jax.random.PRNGKey(0)
    kx, kp = jax.random.split(key)
    x = jax.random.normal(kx, (B, S, H), jnp.float32)
    params = init_params(kp)

    wm = pack_params(params)                         # one-time repack (outside jit)

    out = encoder_layer(x, wm)
    out = jax.block_until_ready(out)

    ref = reference(x, params)
    assert out.shape == (B, S, H)
    err = float(jnp.max(jnp.abs(out - ref)))
    assert jnp.allclose(out, ref, atol=2e-2, rtol=2e-2), err
    print("KERNEL_OK")
</pallas_src>

<mosaic_0001>
module attributes {stable_mosaic.version = 11 : i64} {
  func.func @encoder_layer_kernel(%arg0: memref<16x32xf32, #tpu.memory_space<vmem>>, %arg1: memref<4x64x128xf32, #tpu.memory_space<vmem>>, %arg2: memref<16x32xf32, #tpu.memory_space<vmem>>) attributes {dimension_semantics = [], scalar_prefetch = 0 : i64, scratch_operands = 0 : i64, tpu.core_type = #tpu.core_type<tc>} {
    %c0 = arith.constant 0 : index
    %c0_0 = arith.constant 0 : index
    %0 = vector.load %arg0[%c0, %c0_0] : memref<16x32xf32, #tpu.memory_space<vmem>>, vector<16x32xf32>
    %c0_1 = arith.constant 0 : index
    %c0_2 = arith.constant 0 : index
    %c0_3 = arith.constant 0 : index
    %1 = vector.load %arg1[%c0_1, %c0_2, %c0_3] : memref<4x64x128xf32, #tpu.memory_space<vmem>>, vector<4x32x24xf32>
    %c0_4 = arith.constant 0 : index
    %c0_5 = arith.constant 0 : index
    %c32 = arith.constant 32 : index
    %2 = vector.load %arg1[%c0_4, %c0_5, %c32] : memref<4x64x128xf32, #tpu.memory_space<vmem>>, vector<4x8x32xf32>
    %c0_6 = arith.constant 0 : index
    %c0_7 = arith.constant 0 : index
    %c64 = arith.constant 64 : index
    %3 = vector.load %arg1[%c0_6, %c0_7, %c64] : memref<4x64x128xf32, #tpu.memory_space<vmem>>, vector<1x32x64xf32>
    %4 = vector.shape_cast %3 : vector<1x32x64xf32> to vector<32x64xf32>
    %c1 = arith.constant 1 : index
    %c0_8 = arith.constant 0 : index
    %c64_9 = arith.constant 64 : index
    %5 = vector.load %arg1[%c1, %c0_8, %c64_9] : memref<4x64x128xf32, #tpu.memory_space<vmem>>, vector<1x64x32xf32>
    %6 = vector.shape_cast %5 : vector<1x64x32xf32> to vector<64x32xf32>
    %c2 = arith.constant 2 : index
    %c0_10 = arith.constant 0 : index
    %c64_11 = arith.constant 64 : index
    %7 = vector.load %arg1[%c2, %c0_10, %c64_11] : memref<4x64x128xf32, #tpu.memory_space<vmem>>, vector<1x1x32xf32>
    %8 = vector.shape_cast %7 : vector<1x1x32xf32> to vector<1x32xf32>
    %c2_12 = arith.constant 2 : index
    %c1_13 = arith.constant 1 : index
    %c64_14 = arith.constant 64 : index
    %9 = vector.load %arg1[%c2_12, %c1_13, %c64_14] : memref<4x64x128xf32, #tpu.memory_space<vmem>>, vector<1x1x32xf32>
    %10 = vector.shape_cast %9 : vector<1x1x32xf32> to vector<1x32xf32>
    %c2_15 = arith.constant 2 : index
    %c2_16 = arith.constant 2 : index
    %c64_17 = arith.constant 64 : index
    %11 = vector.load %arg1[%c2_15, %c2_16, %c64_17] : memref<4x64x128xf32, #tpu.memory_space<vmem>>, vector<1x1x32xf32>
    %12 = vector.shape_cast %11 : vector<1x1x32xf32> to vector<1x32xf32>
    %c2_18 = arith.constant 2 : index
    %c3 = arith.constant 3 : index
    %c64_19 = arith.constant 64 : index
    %13 = vector.load %arg1[%c2_18, %c3, %c64_19] : memref<4x64x128xf32, #tpu.memory_space<vmem>>, vector<1x1x32xf32>
    %14 = vector.shape_cast %13 : vector<1x1x32xf32> to vector<1x32xf32>
    %c2_20 = arith.constant 2 : index
    %c4 = arith.constant 4 : index
    %c64_21 = arith.constant 64 : index
    %15 = vector.load %arg1[%c2_20, %c4, %c64_21] : memref<4x64x128xf32, #tpu.memory_space<vmem>>, vector<1x1x32xf32>
    %16 = vector.shape_cast %15 : vector<1x1x32xf32> to vector<1x32xf32>
    %c2_22 = arith.constant 2 : index
    %c5 = arith.constant 5 : index
    %c64_23 = arith.constant 64 : index
    %17 = vector.load %arg1[%c2_22, %c5, %c64_23] : memref<4x64x128xf32, #tpu.memory_space<vmem>>, vector<1x1x64xf32>
    %18 = vector.shape_cast %17 : vector<1x1x64xf32> to vector<1x64xf32>
    %c3_24 = arith.constant 3 : index
    %c0_25 = arith.constant 0 : index
    %c64_26 = arith.constant 64 : index
    %19 = vector.load %arg1[%c3_24, %c0_25, %c64_26] : memref<4x64x128xf32, #tpu.memory_space<vmem>>, vector<1x16x16xf32>
    %20 = vector.shape_cast %19 : vector<1x16x16xf32> to vector<16x16xf32>
    %cst = arith.constant dense<0.000000e+00> : vector<16xf32>
    %21 = vector.multi_reduction <add>, %0, %cst [1] : vector<16x32xf32> to vector<16xf32>
    %22 = vector.shape_cast %21 : vector<16xf32> to vector<16x1xf32>
    %cst_27 = arith.constant 3.200000e+01 : f32
    %23 = vector.broadcast %cst_27 : f32 to vector<16x1xf32>
    %24 = arith.divf %22, %23 : vector<16x1xf32>
    %25 = vector.broadcast %24 : vector<16x1xf32> to vector<16x32xf32>
    %26 = arith.subf %0, %25 : vector<16x32xf32>
    %27 = arith.mulf %26, %26 : vector<16x32xf32>
    %cst_28 = arith.constant dense<0.000000e+00> : vector<16xf32>
    %28 = vector.multi_reduction <add>, %27, %cst_28 [1] : vector<16x32xf32> to vector<16xf32>
    %29 = vector.shape_cast %28 : vector<16xf32> to vector<16x1xf32>
    %cst_29 = arith.constant 0.0322580636 : f32
    %30 = vector.broadcast %cst_29 : f32 to vector<16x1xf32>
    %31 = arith.mulf %29, %30 : vector<16x1xf32>
    %32 = math.sqrt %31 : vector<16x1xf32>
    %cst_30 = arith.constant 9.99999997E-7 : f32
    %33 = vector.broadcast %cst_30 : f32 to vector<16x1xf32>
    %34 = arith.addf %32, %33 : vector<16x1xf32>
    %35 = tpu.reciprocal %34 {approx = true} : vector<16x1xf32> -> vector<16x1xf32>
    %36 = vector.broadcast %24 : vector<16x1xf32> to vector<16x32xf32>
    %37 = arith.subf %0, %36 : vector<16x32xf32>
    %38 = vector.broadcast %8 : vector<1x32xf32> to vector<16x32xf32>
    %39 = arith.mulf %38, %37 : vector<16x32xf32>
    %40 = vector.broadcast %35 : vector<16x1xf32> to vector<16x32xf32>
    %41 = arith.mulf %39, %40 : vector<16x32xf32>
    %42 = vector.broadcast %10 : vector<1x32xf32> to vector<16x32xf32>
    %43 = arith.addf %41, %42 : vector<16x32xf32>
    %44 = arith.truncf %43 : vector<16x32xf32> to vector<16x32xbf16>
    %45 = vector.shape_cast %44 : vector<16x32xbf16> to vector<1x16x32xbf16>
    %46 = vector.broadcast %45 : vector<1x16x32xbf16> to vector<4x16x32xbf16>
    %47 = arith.truncf %1 : vector<4x32x24xf32> to vector<4x32x24xbf16>
    "tpu.trace_start"() <{level = 10 : i32, message = "hnd,hdk->hnk"}> : () -> ()
    %cst_31 = arith.constant dense<0.000000e+00> : vector<4x16x24xf32>
    %48 = tpu.matmul %46, %47, %cst_31 {dimension_numbers = #tpu.dot_dimension_numbers<[2], [1], [1], [2], [0, 0, 0, 1, 1, 2], [0], [0]>} : vector<4x16x32xbf16>, vector<4x32x24xbf16>, vector<4x16x24xf32> -> vector<4x16x24xf32>
    "tpu.trace_stop"() : () -> ()
    %49 = vector.extract_strided_slice %48 {offsets = [0, 0, 0], sizes = [4, 16, 8], strides = [1, 1, 1]} : vector<4x16x24xf32> to vector<4x16x8xf32>
    %50 = arith.truncf %49 : vector<4x16x8xf32> to vector<4x16x8xbf16>
    %51 = vector.extract_strided_slice %48 {offsets = [0, 0, 8], sizes = [4, 16, 8], strides = [1, 1, 1]} : vector<4x16x24xf32> to vector<4x16x8xf32>
    %52 = arith.truncf %51 : vector<4x16x8xf32> to vector<4x16x8xbf16>
    %53 = vector.extract_strided_slice %48 {offsets = [0, 0, 16], sizes = [4, 16, 8], strides = [1, 1, 1]} : vector<4x16x24xf32> to vector<4x16x8xf32>
    %54 = arith.truncf %53 : vector<4x16x8xf32> to vector<4x16x8xbf16>
    "tpu.trace_start"() <{level = 10 : i32, message = "hqd,hkd->hqk"}> : () -> ()
    %cst_32 = arith.constant dense<0.000000e+00> : vector<4x16x16xf32>
    %55 = tpu.matmul %50, %52, %cst_32 {dimension_numbers = #tpu.dot_dimension_numbers<[2], [2], [1], [1], [0, 0, 0, 1, 1, 1], [0], [0]>} : vector<4x16x8xbf16>, vector<4x16x8xbf16>, vector<4x16x16xf32> -> vector<4x16x16xf32>
    "tpu.trace_stop"() : () -> ()
    %56 = vector.shape_cast %20 : vector<16x16xf32> to vector<1x16x16xf32>
    %57 = vector.broadcast %56 : vector<1x16x16xf32> to vector<4x16x16xf32>
    %58 = arith.addf %55, %57 : vector<4x16x16xf32>
    %cst_33 = arith.constant dense<0xFF800000> : vector<4x16xf32>
    %59 = vector.multi_reduction <maximumf>, %58, %cst_33 [2] : vector<4x16x16xf32> to vector<4x16xf32>
    %60 = vector.shape_cast %59 : vector<4x16xf32> to vector<4x16x1xf32>
    %61 = vector.broadcast %60 : vector<4x16x1xf32> to vector<4x16x16xf32>
    %62 = arith.subf %58, %61 : vector<4x16x16xf32>
    %63 = math.exp %62 : vector<4x16x16xf32>
    %cst_34 = arith.constant dense<0.000000e+00> : vector<4x16xf32>
    %64 = vector.multi_reduction <add>, %63, %cst_34 [2] : vector<4x16x16xf32> to vector<4x16xf32>
    %65 = vector.shape_cast %64 : vector<4x16xf32> to vector<4x16x1xf32>
    %66 = tpu.reciprocal %65 {approx = true} : vector<4x16x1xf32> -> vector<4x16x1xf32>
    %67 = vector.broadcast %66 : vector<4x16x1xf32> to vector<4x16x16xf32>
    %68 = arith.mulf %63, %67 : vector<4x16x16xf32>
    %69 = arith.truncf %68 : vector<4x16x16xf32> to vector<4x16x16xbf16>
    "tpu.trace_start"() <{level = 10 : i32, message = "hqk,hkd->hqd"}> : () -> ()
    %cst_35 = arith.constant dense<0.000000e+00> : vector<4x16x8xf32>
    %70 = tpu.matmul %69, %54, %cst_35 {dimension_numbers = #tpu.dot_dimension_numbers<[2], [1], [1], [2], [0, 0, 0, 1, 1, 2], [0], [0]>} : vector<4x16x16xbf16>, vector<4x16x8xbf16>, vector<4x16x8xf32> -> vector<4x16x8xf32>
    "tpu.trace_stop"() : () -> ()
    %71 = arith.truncf %2 : vector<4x8x32xf32> to vector<4x8x32xbf16>
    %72 = vector.extract_strided_slice %70 {offsets = [0, 0, 0], sizes = [1, 16, 8], strides = [1, 1, 1]} : vector<4x16x8xf32> to vector<1x16x8xf32>
    %73 = vector.shape_cast %72 : vector<1x16x8xf32> to vector<16x8xf32>
    %74 = arith.truncf %73 : vector<16x8xf32> to vector<16x8xbf16>
    %75 = vector.extract_strided_slice %71 {offsets = [0, 0, 0], sizes = [1, 8, 32], strides = [1, 1, 1]} : vector<4x8x32xbf16> to vector<1x8x32xbf16>
    %76 = vector.shape_cast %75 : vector<1x8x32xbf16> to vector<8x32xbf16>
    %cst_36 = arith.constant dense<0.000000e+00> : vector<16x32xf32>
    %77 = tpu.matmul %74, %76, %cst_36 {dimension_numbers = #tpu.dot_dimension_numbers<[1], [0], [0], [1], [0, 0, 1, 1], [], []>} : vector<16x8xbf16>, vector<8x32xbf16>, vector<16x32xf32> -> vector<16x32xf32>
    %78 = vector.extract_strided_slice %70 {offsets = [1, 0, 0], sizes = [1, 16, 8], strides = [1, 1, 1]} : vector<4x16x8xf32> to vector<1x16x8xf32>
    %79 = vector.shape_cast %78 : vector<1x16x8xf32> to vector<16x8xf32>
    %80 = arith.truncf %79 : vector<16x8xf32> to vector<16x8xbf16>
    %81 = vector.extract_strided_slice %71 {offsets = [1, 0, 0], sizes = [1, 8, 32], strides = [1, 1, 1]} : vector<4x8x32xbf16> to vector<1x8x32xbf16>
    %82 = vector.shape_cast %81 : vector<1x8x32xbf16> to vector<8x32xbf16>
    %cst_37 = arith.constant dense<0.000000e+00> : vector<16x32xf32>
    %83 = tpu.matmul %80, %82, %cst_37 {dimension_numbers = #tpu.dot_dimension_numbers<[1], [0], [0], [1], [0, 0, 1, 1], [], []>} : vector<16x8xbf16>, vector<8x32xbf16>, vector<16x32xf32> -> vector<16x32xf32>
    %84 = arith.addf %77, %83 : vector<16x32xf32>
    %85 = vector.extract_strided_slice %70 {offsets = [2, 0, 0], sizes = [1, 16, 8], strides = [1, 1, 1]} : vector<4x16x8xf32> to vector<1x16x8xf32>
    %86 = vector.shape_cast %85 : vector<1x16x8xf32> to vector<16x8xf32>
    %87 = arith.truncf %86 : vector<16x8xf32> to vector<16x8xbf16>
    %88 = vector.extract_strided_slice %71 {offsets = [2, 0, 0], sizes = [1, 8, 32], strides = [1, 1, 1]} : vector<4x8x32xbf16> to vector<1x8x32xbf16>
    %89 = vector.shape_cast %88 : vector<1x8x32xbf16> to vector<8x32xbf16>
    %cst_38 = arith.constant dense<0.000000e+00> : vector<16x32xf32>
    %90 = tpu.matmul %87, %89, %cst_38 {dimension_numbers = #tpu.dot_dimension_numbers<[1], [0], [0], [1], [0, 0, 1, 1], [], []>} : vector<16x8xbf16>, vector<8x32xbf16>, vector<16x32xf32> -> vector<16x32xf32>
    %91 = arith.addf %84, %90 : vector<16x32xf32>
    %92 = vector.extract_strided_slice %70 {offsets = [3, 0, 0], sizes = [1, 16, 8], strides = [1, 1, 1]} : vector<4x16x8xf32> to vector<1x16x8xf32>
    %93 = vector.shape_cast %92 : vector<1x16x8xf32> to vector<16x8xf32>
    %94 = arith.truncf %93 : vector<16x8xf32> to vector<16x8xbf16>
    %95 = vector.extract_strided_slice %71 {offsets = [3, 0, 0], sizes = [1, 8, 32], strides = [1, 1, 1]} : vector<4x8x32xbf16> to vector<1x8x32xbf16>
    %96 = vector.shape_cast %95 : vector<1x8x32xbf16> to vector<8x32xbf16>
    %cst_39 = arith.constant dense<0.000000e+00> : vector<16x32xf32>
    %97 = tpu.matmul %94, %96, %cst_39 {dimension_numbers = #tpu.dot_dimension_numbers<[1], [0], [0], [1], [0, 0, 1, 1], [], []>} : vector<16x8xbf16>, vector<8x32xbf16>, vector<16x32xf32> -> vector<16x32xf32>
    %98 = arith.addf %91, %97 : vector<16x32xf32>
    %99 = arith.addf %0, %98 : vector<16x32xf32>
    %cst_40 = arith.constant dense<0.000000e+00> : vector<16xf32>
    %100 = vector.multi_reduction <add>, %99, %cst_40 [1] : vector<16x32xf32> to vector<16xf32>
    %101 = vector.shape_cast %100 : vector<16xf32> to vector<16x1xf32>
    %cst_41 = arith.constant 3.200000e+01 : f32
    %102 = vector.broadcast %cst_41 : f32 to vector<16x1xf32>
    %103 = arith.divf %101, %102 : vector<16x1xf32>
    %104 = vector.broadcast %103 : vector<16x1xf32> to vector<16x32xf32>
    %105 = arith.subf %99, %104 : vector<16x32xf32>
    %106 = arith.mulf %105, %105 : vector<16x32xf32>
    %cst_42 = arith.constant dense<0.000000e+00> : vector<16xf32>
    %107 = vector.multi_reduction <add>, %106, %cst_42 [1] : vector<16x32xf32> to vector<16xf32>
    %108 = vector.shape_cast %107 : vector<16xf32> to vector<16x1xf32>
    %cst_43 = arith.constant 0.0322580636 : f32
    %109 = vector.broadcast %cst_43 : f32 to vector<16x1xf32>
    %110 = arith.mulf %108, %109 : vector<16x1xf32>
    %111 = math.sqrt %110 : vector<16x1xf32>
    %cst_44 = arith.constant 9.99999997E-7 : f32
    %112 = vector.broadcast %cst_44 : f32 to vector<16x1xf32>
    %113 = arith.addf %111, %112 : vector<16x1xf32>
    %114 = tpu.reciprocal %113 {approx = true} : vector<16x1xf32> -> vector<16x1xf32>
    %115 = vector.broadcast %103 : vector<16x1xf32> to vector<16x32xf32>
    %116 = arith.subf %99, %115 : vector<16x32xf32>
    %117 = vector.broadcast %12 : vector<1x32xf32> to vector<16x32xf32>
    %118 = arith.mulf %117, %116 : vector<16x32xf32>
    %119 = vector.broadcast %114 : vector<16x1xf32> to vector<16x32xf32>
    %120 = arith.mulf %118, %119 : vector<16x32xf32>
    %121 = vector.broadcast %14 : vector<1x32xf32> to vector<16x32xf32>
    %122 = arith.addf %120, %121 : vector<16x32xf32>
    %123 = arith.truncf %122 : vector<16x32xf32> to vector<16x32xbf16>
    %124 = arith.truncf %4 : vector<32x64xf32> to vector<32x64xbf16>
    %cst_45 = arith.constant dense<0.000000e+00> : vector<16x64xf32>
    %125 = tpu.matmul %123, %124, %cst_45 {dimension_numbers = #tpu.dot_dimension_numbers<[1], [0], [0], [1], [0, 0, 1, 1], [], []>} : vector<16x32xbf16>, vector<32x64xbf16>, vector<16x64xf32> -> vector<16x64xf32>
    %126 = vector.broadcast %18 : vector<1x64xf32> to vector<16x64xf32>
    %127 = arith.addf %125, %126 : vector<16x64xf32>
    %cst_46 = arith.constant 0.000000e+00 : f32
    %128 = vector.broadcast %cst_46 : f32 to vector<16x64xf32>
    %129 = arith.maximumf %127, %128 : vector<16x64xf32>
    %130 = arith.truncf %129 : vector<16x64xf32> to vector<16x64xbf16>
    %131 = arith.truncf %6 : vector<64x32xf32> to vector<64x32xbf16>
    %cst_47 = arith.constant dense<0.000000e+00> : vector<16x32xf32>
    %132 = tpu.matmul %130, %131, %cst_47 {dimension_numbers = #tpu.dot_dimension_numbers<[1], [0], [0], [1], [0, 0, 1, 1], [], []>} : vector<16x64xbf16>, vector<64x32xbf16>, vector<16x32xf32> -> vector<16x32xf32>
    %133 = vector.broadcast %16 : vector<1x32xf32> to vector<16x32xf32>
    %134 = arith.addf %132, %133 : vector<16x32xf32>
    %cst_48 = arith.constant 0.000000e+00 : f32
    %135 = vector.broadcast %cst_48 : f32 to vector<16x32xf32>
    %136 = arith.maximumf %134, %135 : vector<16x32xf32>
    %137 = arith.addf %99, %136 : vector<16x32xf32>
    %c0_49 = arith.constant 0 : index
    %c0_50 = arith.constant 0 : index
    %138 = vector.load %arg2[%c0_49, %c0_50] : memref<16x32xf32, #tpu.memory_space<vmem>>, vector<16x32xf32>
    tpu.vector_store %arg2[%c0_49, %c0_50], %137 {strides = array<i32>} : memref<16x32xf32, #tpu.memory_space<vmem>>, vector<16x32xf32>,
    return
  }
}

</mosaic_0001>

<bundles_post_ra>
// kernel: encoder_layer.1
= control target key start
LH: loop header
LB: loop body
LE: loop exit
PB: predicated region body
PF: predicated region fallthrough
CT: control target
= control target key end

     0   :  { %7 = vsyncpa [#allocation3], 0  ;;  %s1868_s0 = inlined_call_operand.hbm [shape: f32[16,32], index: 0, kind: input, shape index: {}]   ;;  %s1869_s1 = inlined_call_operand.hbm [shape: f32[4,64,128], index: 1, kind: input, shape index: {}]   ;;  %s1870_s2 = inlined_call_operand.hbm [shape: f32[16,32], index: 2, kind: output, shape index: {}]  }
   0x1   :  { %8 = vsyncpa [#allocation6], 0 }
   0x2   :  { %9 = vsyncpa [#allocation4], 0  ;;  %s1575_s9 = smov [#allocation2]   ;;  %s1503_s13 = scalar_lea.hbm %s1868_s0, 256 }
   0x3   :  { %s15_s10 = sshll.u32 %s1575_s9, 4  ;;  %p1504_p0 = scmp.ne.s32.totalorder %s1868_s0, %s1503_s13  ;;  %s16_s10 = int_to_ptr.vmem [resolvable:$true] %s15_s10 }
   0x4   :  { %p1507_p1 = scmp.lt.u32.totalorder %s1503_s13, %s1868_s0 }
   0x6   :  { %p1509_p2 = pnand %p1507_p1, %p1504_p0 }
   0x8   :  { %1512 = shalt.err (!%p1509_p2)
}
   0x9   :  { %s1513_s18 = scalar_lea.vmem %s16_s10, 256  ;;  %p1518_p4 = scmp.lt.s32.totalorder %s16_s10, %s16_s10 }
   0xa   :  { %p1514_p3 = scmp.ne.s32.totalorder %s16_s10, %s1513_s18  ;;  %p1519_p5 = scmp.lt.s32.totalorder %s1513_s18, %s1513_s18 }
   0xc   :  { %p1520_p6 = por %p1519_p5, %p1518_p4 }
   0xe   :  { %p1521_p7 = pnand %p1520_p6, %p1514_p3 }
  0x10   :  { %1524 = shalt.err (!%p1521_p7)
}
  0x11   :  { %s1576_s19 = smov 128   ;;  %s1577_s20 = smov 8  }
  0x12   :  { %21 = dma.hbm_to_vmem [thread:$0]  %s1868_s0, 256, %s16_s10, [#allocation3], %s1576_s19, %s1576_s19, %s1577_s20  }
  0x13   :  { %s1578_s23 = smov [#allocation5]   ;;  %s1525_s27 = scalar_lea.hbm %s1869_s1, 4096 }
  0x14   :  { %s27_s24 = sshll.u32 %s1578_s23, 4  ;;  %p1526_p8 = scmp.ne.s32.totalorder %s1869_s1, %s1525_s27  ;;  %s28_s24 = int_to_ptr.vmem [resolvable:$true] %s27_s24 }
  0x15   :  { %p1529_p9 = scmp.lt.u32.totalorder %s1525_s27, %s1869_s1 }
  0x17   :  { %p1531_p10 = pnand %p1529_p9, %p1526_p8 }
  0x19   :  { %1534 = shalt.err (!%p1531_p10)
}
  0x1a   :  { %s1535_s4 = scalar_lea.vmem %s28_s24, 4096  ;;  %p1540_p12 = scmp.lt.s32.totalorder %s28_s24, %s28_s24 }
  0x1b   :  { %p1536_p11 = scmp.ne.s32.totalorder %s28_s24, %s1535_s4  ;;  %p1541_p13 = scmp.lt.s32.totalorder %s1535_s4, %s1535_s4 }
  0x1d   :  { %p1542_p0 = por %p1541_p13, %p1540_p12 }
  0x1f   :  { %p1543_p1 = pnand %p1542_p0, %p1536_p11 }
  0x21   :  { %1546 = shalt.err (!%p1543_p1)
}
  0x22   :  { %33 = dma.hbm_to_vmem [thread:$0]  %s1869_s1, 4096, %s28_s24, [#allocation6], %s1576_s19, %s1576_s19, %s1577_s20  }
  0x23   :  { %1569 = dma.done.wait [#allocation3], 256  }
  0x24   :  { %1570 = vsyncadd [#allocation3], 4294967040 }
  0x25   :  { %1571 = dma.done.wait [#allocation6], 4096  }
  0x26   :  { %1572 = vsyncadd [#allocation6], 4294963200  ;;  %vm78_vm0 = vcmask 261120   ;;  %v1631_v0 = vld [vmem:[#allocation2] sm:$0xff]  ;;  %v1633_v1 = vld [vmem:[#allocation2 + $0x8] sm:$0xff]  ;;  %s1579_s1 = smov 64  }
  0x27   :  { %v79_v2 = vsel %vm78_vm0, %v1631_v0, 0.0  ;;  %v82_v3 = vsel %vm78_vm0, %v1633_v1, 0.0  ;;  %v1645_v14 = vld [vmem:[#allocation5] sm:$0xff]  ;;  %v44_v15 = vld [vmem:[#allocation5 + $0x8] sm:$0xff]  ;;  %v1580_v17 = vmov 0.0   ;;  %v45_v20 = vld [vmem:[#allocation5 + $0x10] sm:$0xff] }
  0x28   :  { %80 = vadd.xlane.f32.xlu0 %v79_v2  ;;  %v1647_v16 = vld [vmem:[#allocation5 + $0x40] sm:$0xff]  ;;  %1320 = vmatprep.subr.bf16.mxu0 %v1580_v17  ;;  %v1652_v18 = vpack.c.bf16 %v44_v15, %v1645_v14  ;;  %v48_v19 = vld [vmem:[#allocation5 + $0x48] sm:$0xff]  ;;  %v46_v21 = vld [vmem:[#allocation5 + $0x18] sm:$0xff]  ;;  %vm1581_vm1 = vmmov 0   ;;  %s1582_s6 = smov 120   ;;  %vm334_vm6 = vcmask 64512  }
  0x29   :  { %1328 = vmatprep.subr.bf16.mxu1 %v1580_v17  ;;  %v1655_v22 = vpack.c.bf16 %v48_v19, %v1647_v16  ;;  %v49_v23 = vld [vmem:[#allocation5 + $0x50] sm:$0xff]  ;;  %v50_v24 = vld [vmem:[#allocation5 + $0x58] sm:$0xff]  ;;  %1324 = vmatprep.mubr.msk.bf16.mxu0 %vm1581_vm1, %v1580_v17  ;;  %v1662_v25 = vpack.c.bf16 %v46_v21, %v45_v20  ;;  %v1252_v43 = vld [vmem:[#allocation5 + $0x80] ss:$0 sm:$0xff]  ;;  %vm532_vm7 = vcmask 130048   ;;  %s1583_s7 = smov 112  }
  0x2a   :  { %1332 = vmatprep.mubr.msk.bf16.mxu1 %vm1581_vm1, %v1580_v17  ;;  %1321 = vmatpush3.bf16.msra.mxu0 %v1652_v18  ;;  %v1666_v26 = vpack.c.bf16 %v50_v24, %v49_v23  ;;  %v1253_v51 = vld [vmem:[#allocation5 + $0x81] ss:$0 sm:$0xff]  ;;  %v52_v57 = vld [vmem:[#allocation5 + $0x88] sm:$0xff]  ;;  %v53_v62 = vld [vmem:[#allocation5 + $0x90] sm:$0xff]  ;;  %s1584_s8 = smov 96   ;;  %vm825_vm8 = vcmask 1043456  }
  0x2b   :  { %1329 = vmatpush3.bf16.msra.mxu1 %v1655_v22  ;;  %1322 = vmatprep.subr.bf16.mxu0 %v1580_v17  ;;  %v1674_v56 = vld [vmem:[#allocation5 + $0x80] sm:$0xff]  ;;  %v56_v59 = vld [vmem:[#allocation5 + $0xc8] sm:$0xff]  ;;  %v54_v63 = vld [vmem:[#allocation5 + $0x98] sm:$0xff]  ;;  %vm1183_vm13 = vcmask 523264   ;;  %s1585_s9 = smov [#allocation7]  }
  0x2c   :  { %83 = vadd.xlane.f32.xlu0 %v82_v3  ;;  %1330 = vmatprep.subr.bf16.mxu1 %v1580_v17  ;;  %v1676_v58 = vld [vmem:[#allocation5 + $0xc0] sm:$0xff]  ;;  %v145_v60 = vpack.c.bf16 %v52_v57, %v1674_v56  ;;  %v57_v2 = vld [vmem:[#allocation5 + $0xd0] sm:$0xff]  ;;  %v58_v3 = vld [vmem:[#allocation5 + $0xd8] sm:$0xff]  ;;  %s1239_s10 = sshll.u32 %s1585_s9, 4  ;;  %s1240_s10 = int_to_ptr.vmem [resolvable:$true] %s1239_s10 }
  0x2d   :  { %v147_v61 = vpack.c.bf16 %v56_v59, %v1676_v58  ;;  %s1547_s11 = scalar_lea.vmem %s1240_s10, 256  ;;  %p1552_p3 = scmp.lt.s32.totalorder %s1240_s10, %s1240_s10 }
  0x2e   :  { %1323 = vmatpush3.bf16.msra.mxu0 %v1662_v25  ;;  %p1548_p2 = scmp.ne.s32.totalorder %s1240_s10, %s1547_s11  ;;  %p1553_p4 = scmp.lt.s32.totalorder %s1547_s11, %s1547_s11 }
  0x2f   :  { %1331 = vmatpush3.bf16.msra.mxu1 %v1666_v26  ;;  %1336 = vmatprep.subr.bf16.mxu0 %v1580_v17 }
  0x30   :  { %1344 = vmatprep.subr.bf16.mxu1 %v1580_v17  ;;  %p1554_p5 = por %p1553_p4, %p1552_p3 }
  0x32   :  { %p1555_p6 = pnand %p1554_p5, %p1548_p2 }
  0xb5   :  { %v81_v4 = vpop.xlane.xlu0 %80 }
  0xb6   :  { %v86_v5 = vmul.f32 0.03125, %v81_v4 }
  0xb8   :  { %v88_v6 = vsub.f32 %v1631_v0, %v86_v5  ;;  %v146_v5 = vpack.c.bf16 %v54_v63, %v53_v62 }
  0xb9   :  { %v84_v7 = vpop.xlane.xlu0 %83 }
  0xba   :  { %v87_v8 = vmul.f32 0.03125, %v84_v7  ;;  %124 = vrot.lane.b32.xlu0 %v88_v6, %s1579_s1  ;;  %v90_v9 = vmul.f32 %v88_v6, %v88_v6  ;;  %v148_v6 = vpack.c.bf16 %v58_v3, %v57_v2 }
  0xbc   :  { %v89_v10 = vsub.f32 %v1633_v1, %v87_v8  ;;  %v92_v11 = vsel %vm78_vm0, %v90_v9, 0.0 }
  0xbd   :  { %93 = vadd.xlane.f32.xlu1 %v92_v11 }
  0xbe   :  { %v91_v12 = vmul.f32 %v89_v10, %v89_v10 }
  0xc0   :  { %v95_v13 = vsel %vm78_vm0, %v91_v12, 0.0 }
  0xc1   :  { %96 = vadd.xlane.f32.xlu1 %v95_v13 }
  0xd2   :  { %126 = vrot.lane.b32.xlu1 %v89_v10, %s1579_s1 }
 0x12c   :  { %v125_v44 = vpop.permute.xlu0 %124 }
 0x12d   :  { %v130_v47 = vmul.f32 %v1252_v43, %v125_v44 }
 0x14a   :  { %v94_v27 = vpop.xlane.xlu1 %93 }
 0x14b   :  { %v98_v28 = vmul.f32 0.032258064, %v94_v27 }
 0x14d   :  { %1455 = vrsqrt.f32 %v98_v28  ;;  %vm102_vm2 = vcmp.eq.f32.partialorder %v98_v28, inf  ;;  %v105_v33 = vand.u32 2147483648, %v98_v28  ;;  %vm104_vm3 = vcmp.eq.f32.partialorder %v98_v28, 0.0 }
 0x14e   :  { %v97_v29 = vpop.xlane.xlu1 %96 }
 0x14f   :  { %v99_v30 = vmul.f32 0.032258064, %v97_v29 }
 0x151   :  { %1457 = vrsqrt.f32 %v99_v30  ;;  %vm109_vm4 = vcmp.eq.f32.partialorder %v99_v30, inf  ;;  %v112_v39 = vand.u32 2147483648, %v99_v30  ;;  %vm111_vm5 = vcmp.eq.f32.partialorder %v99_v30, 0.0 }
 0x152   :  { %v127_v46 = vpop.permute.xlu1 %126 }
 0x153   :  { %v131_v48 = vmul.f32 %v1252_v43, %v127_v46 }
 0x157   :  { %v1456_v31 = vpop.eup %1455 }
 0x158   :  { %v101_v32 = vmul.f32 %v1456_v31, %v98_v28 }
 0x15a   :  { %v103_v34 = vsel %vm102_vm2, %v98_v28, %v101_v32 }
 0x15b   :  { %v1458_v35 = vpop.eup %1457  ;;  %v106_v36 = vsel %vm104_vm3, %v105_v33, %v103_v34 }
 0x15c   :  { %v108_v37 = vmul.f32 %v1458_v35, %v99_v30  ;;  %v114_v38 = vadd.f32 1e-06, %v106_v36 }
 0x15e   :  { %v110_v40 = vsel %vm109_vm4, %v99_v30, %v108_v37  ;;  %1459 = vrcp.f32 %v114_v38 }
 0x15f   :  { %v113_v41 = vsel %vm111_vm5, %v112_v39, %v110_v40 }
 0x160   :  { %v115_v42 = vadd.f32 1e-06, %v113_v41 }
 0x162   :  { %1461 = vrcp.f32 %v115_v42 }
 0x168   :  { %v1460_v45 = vpop.eup %1459 }
 0x169   :  { %v132_v49 = vmul.f32 %v1460_v45, %v130_v47 }
 0x16b   :  { %v138_v54 = vadd.f32 %v1253_v51, %v132_v49 }
 0x16c   :  { %v1462_v50 = vpop.eup %1461 }
 0x16d   :  { %v133_v52 = vmul.f32 %v1462_v50, %v131_v48 }
 0x16f   :  { %v139_v53 = vadd.f32 %v1253_v51, %v133_v52 }
 0x171   :  { %v140_v55 = vpack.c.bf16 %v139_v53, %v138_v54 }
 0x173   :  { %150 = vrot.lane.b32.xlu1 %v140_v55, %s1579_s1 }
 0x1e5   :  { %v151_v4 = vpop.permute.xlu1 %150 }
 0x1e6   :  { %1325 = vmatmul.mubr.msk.bf16.vlgmr.msra.gmra.mrb[0].mxu0 %vm78_vm0, %v151_v4  ;;  %1333 = vmatmul.mubr.msk.bf16.vlgmr.msra.gmra.mrb[0].mxu1 %vm78_vm0, %v151_v4 }
 0x1e7   :  { %1337 = vmatpush3.bf16.msra.mxu0 %v145_v60  ;;  %1345 = vmatpush3.bf16.msra.mxu1 %v147_v61 }
 0x1e8   :  { %1338 = vmatprep.subr.bf16.mxu0 %v1580_v17  ;;  %1346 = vmatprep.subr.bf16.mxu1 %v1580_v17 }
 0x1e9   :  { %1340 = vmatprep.mubr.msk.bf16.mxu0 %vm1581_vm1, %v1580_v17  ;;  %1348 = vmatprep.mubr.msk.bf16.mxu1 %vm1581_vm1, %v1580_v17 }
 0x1eb   :  { %1339 = vmatpush3.bf16.msra.mxu0 %v146_v5  ;;  %1347 = vmatpush3.bf16.msra.mxu1 %v148_v6 }
 0x1ec   :  { %1352 = vmatprep.subr.bf16.mxu0 %v1580_v17  ;;  %1358 = vmatprep.subr.bf16.mxu1 %v1580_v17 }
 0x1ee   :  { %1341 = vmatmul.mubr.msk.bf16.vlgmr.msra.gmra.mrb[4].mxu0 %vm78_vm0, %v151_v4  ;;  %1349 = vmatmul.mubr.msk.bf16.vlgmr.msra.gmra.mrb[4].mxu1 %vm78_vm0, %v151_v4 }
 0x1ef   :  { %1360 = vmatprep.mubr.msk.bf16.mxu1 %vm1581_vm1, %v1580_v17  ;;  %1354 = vmatprep.mubr.msk.bf16.mxu0 %vm1581_vm1, %v1580_v17 }
 0x2b9   :  { %v189_v7 = vpop.f32.mrb[0].mxu0  ;;  %v230_v8 = vpop.f32.mrb[0].mxu1 }
 0x2ba   :  { %v1326_v9 = vpop.f32.mrb[1].mxu0  ;;  %v1334_v10 = vpop.f32.mrb[1].mxu1 }
 0x2bb   :  { %v192_v11 = vpop.f32.mrb[2].mxu0  ;;  %v233_v12 = vpop.f32.mrb[2].mxu1 }
 0x2bc   :  { %v1696_v13 = vpack.c.bf16 %v192_v11, %v189_v7  ;;  %v1698_v15 = vpack.c.bf16 %v233_v12, %v230_v8  ;;  %v1327_v19 = vpop.f32.mrb[3].mxu0  ;;  %v1335_v20 = vpop.f32.mrb[3].mxu1 }
 0x2be   :  { %383 = vrot.lane.b32.xlu0 %v1698_v15, %s1582_s6  ;;  %324 = vrot.lane.b32.xlu1 %v1696_v13, %s1582_s6 }
 0x2c1   :  { %v271_v21 = vpop.f32.mrb[4].mxu0  ;;  %v312_v23 = vpop.f32.mrb[4].mxu1 }
 0x2c2   :  { %v1342_v24 = vpop.f32.mrb[5].mxu0  ;;  %v1350_v27 = vpop.f32.mrb[5].mxu1 }
 0x2c3   :  { %v274_v28 = vpop.f32.mrb[6].mxu0  ;;  %v315_v29 = vpop.f32.mrb[6].mxu1 }
 0x2c4   :  { %v1702_v30 = vpack.c.bf16 %v274_v28, %v271_v21  ;;  %v1704_v31 = vpack.c.bf16 %v315_v29, %v312_v23  ;;  %v1343_v32 = vpop.f32.mrb[7].mxu0  ;;  %v1351_v33 = vpop.f32.mrb[7].mxu1 }
 0x2c6   :  { %483 = vrot.lane.b32.xlu0 %v1704_v31, %s1582_s6  ;;  %433 = vrot.lane.b32.xlu1 %v1702_v30, %s1582_s6 }
 0x2ca   :  { %328 = vrot.lane.b32.xlu1 %v1676_v58, %s1579_s1  ;;  %330 = vrot.lane.b32.xlu0 %v56_v59, %s1579_s1 }
 0x330   :  { %v384_v34 = vpop.permute.xlu0 %383  ;;  %v325_v35 = vpop.permute.xlu1 %324 }
 0x331   :  { %v389_v36 = vsel %vm334_vm6, %v384_v34, 0  ;;  %v339_v37 = vsel %vm334_vm6, %v325_v35, 0 }
 0x332   :  { %1353 = vmatpush3.bf16.xpose.msra.mxu0 %v339_v37  ;;  %1359 = vmatpush3.bf16.xpose.msra.mxu1 %v389_v36 }
 0x333   :  { %1364 = vmatprep.subr.bf16.mxu0 %v1580_v17  ;;  %1370 = vmatprep.subr.bf16.mxu1 %v1580_v17 }
 0x338   :  { %v484_v38 = vpop.permute.xlu0 %483  ;;  %v434_v39 = vpop.permute.xlu1 %433 }
 0x339   :  { %v489_v40 = vsel %vm334_vm6, %v484_v38, 0  ;;  %v439_v41 = vsel %vm334_vm6, %v434_v39, 0  ;;  %1355 = vmatmul.mubr.msk.bf16.vlgmr.msra.gmra.mrb[8].mxu0 %vm334_vm6, %v1696_v13  ;;  %1361 = vmatmul.mubr.msk.bf16.vlgmr.msra.gmra.mrb[8].mxu1 %vm334_vm6, %v1698_v15 }
 0x33a   :  { %1365 = vmatpush3.bf16.xpose.msra.mxu0 %v439_v41  ;;  %1371 = vmatpush3.bf16.xpose.msra.mxu1 %v489_v40 }
 0x33b   :  { %1366 = vmatprep.mubr.msk.bf16.mxu0 %vm1581_vm1, %v1580_v17  ;;  %1372 = vmatprep.mubr.msk.bf16.mxu1 %vm1581_vm1, %v1580_v17 }
 0x33c   :  { %1376 = vmatprep.subr.bf16.mxu0 %v1580_v17  ;;  %1382 = vmatprep.subr.bf16.mxu1 %v1580_v17  ;;  %v329_v42 = vpop.permute.xlu1 %328  ;;  %v331_v43 = vpop.permute.xlu0 %330 }
 0x341   :  { %1367 = vmatmul.mubr.msk.bf16.vlgmr.msra.gmra.mrb[12].mxu0 %vm334_vm6, %v1702_v30  ;;  %1373 = vmatmul.mubr.msk.bf16.vlgmr.msra.gmra.mrb[12].mxu1 %vm334_vm6, %v1704_v31 }
 0x342   :  { %1378 = vmatprep.mubr.msk.bf16.mxu0 %vm1581_vm1, %v1580_v17  ;;  %1384 = vmatprep.mubr.msk.bf16.mxu1 %vm1581_vm1, %v1580_v17 }
 0x40c   :  { %v425_v44 = vpop.f32.mrb[8].mxu1  ;;  %v375_v45 = vpop.f32.mrb[8].mxu0 }
 0x40d   :  { %v376_v46 = vadd.f32 %v375_v45, %v329_v42  ;;  %v1356_v47 = vpop.f32.mrb[9].mxu0  ;;  %v1362_v48 = vpop.f32.mrb[9].mxu1  ;;  %v426_v49 = vadd.f32 %v425_v44, %v329_v42 }
 0x40e   :  { %v378_v50 = vpop.f32.mrb[10].mxu0  ;;  %v428_v51 = vpop.f32.mrb[10].mxu1 }
 0x40f   :  { %v379_v52 = vadd.f32 %v378_v50, %v331_v43  ;;  %v1357_v53 = vpop.f32.mrb[11].mxu0  ;;  %v1363_v54 = vpop.f32.mrb[11].mxu1  ;;  %v539_v55 = vsel %vm532_vm7, %v426_v49, -inf  ;;  %v533_v57 = vsel %vm532_vm7, %v376_v46, -inf  ;;  %v429_v59 = vadd.f32 %v428_v51, %v331_v43 }
 0x410   :  { %540 = vmax.xlane.f32.xlu0 %v539_v55  ;;  %534 = vmax.xlane.f32.xlu1 %v533_v57 }
 0x411   :  { %v536_v60 = vsel %vm532_vm7, %v379_v52, -inf  ;;  %v542_v10 = vsel %vm532_vm7, %v429_v59, -inf }
 0x414   :  { %v525_v61 = vpop.f32.mrb[12].mxu1  ;;  %537 = vmax.xlane.f32.xlu0 %v536_v60  ;;  %v475_v62 = vpop.f32.mrb[12].mxu0 }
 0x415   :  { %v476_v63 = vadd.f32 %v475_v62, %v329_v42  ;;  %v1368_v2 = vpop.f32.mrb[13].mxu0  ;;  %v1374_v3 = vpop.f32.mrb[13].mxu1  ;;  %v526_v6 = vadd.f32 %v525_v61, %v329_v42 }
 0x416   :  { %v478_v4 = vpop.f32.mrb[14].mxu0  ;;  %v528_v5 = vpop.f32.mrb[14].mxu1 }
 0x417   :  { %v479_v7 = vadd.f32 %v478_v4, %v331_v43  ;;  %v1369_v8 = vpop.f32.mrb[15].mxu0  ;;  %v1375_v9 = vpop.f32.mrb[15].mxu1  ;;  %v545_v11 = vsel %vm532_vm7, %v476_v63, -inf  ;;  %v529_v12 = vadd.f32 %v528_v5, %v331_v43  ;;  %v551_v19 = vsel %vm532_vm7, %v526_v6, -inf }
 0x418   :  { %543 = vmax.xlane.f32.xlu0 %v542_v10  ;;  %546 = vmax.xlane.f32.xlu1 %v545_v11  ;;  %v814_v8 = vpack.c.bf16 %v1647_v16, %v1647_v16  ;;  %v815_v9 = vpack.c.bf16 %v1674_v56, %v1674_v56 }
 0x419   :  { %v548_v20 = vsel %vm532_vm7, %v479_v7, -inf  ;;  %v554_v21 = vsel %vm532_vm7, %v529_v12, -inf }
 0x41c   :  { %552 = vmax.xlane.f32.xlu1 %v551_v19  ;;  %549 = vmax.xlane.f32.xlu0 %v548_v20 }
 0x420   :  { %555 = vmax.xlane.f32.xlu0 %v554_v21 }
 0x42d   :  { %625 = vrot.lane.b32.xlu1 %v1696_v13, %s1583_s7 }
 0x49d   :  { %v541_v23 = vpop.xlane.xlu0 %540  ;;  %v535_v24 = vpop.xlane.xlu1 %534 }
 0x49e   :  { %v559_v27 = vsub.f32 %v426_v49, %v541_v23  ;;  %v557_v28 = vsub.f32 %v376_v46, %v535_v24 }
 0x4a0   :  { %v565_v29 = vmul.f32 1.442695, %v557_v28  ;;  %v569_v32 = vmul.f32 1.442695, %v559_v27 }
 0x4a1   :  { %v538_v33 = vpop.xlane.xlu0 %537 }
 0x4a2   :  { %v558_v34 = vsub.f32 %v379_v52, %v538_v33  ;;  %1463 = vpow2.f32 %v565_v29 }
 0x4a3   :  { %1465 = vpow2.f32 %v569_v32 }
 0x4a4   :  { %v567_v35 = vmul.f32 1.442695, %v558_v34 }
 0x4a5   :  { %v544_v36 = vpop.xlane.xlu0 %543  ;;  %v547_v37 = vpop.xlane.xlu1 %546 }
 0x4a6   :  { %1467 = vpow2.f32 %v567_v35  ;;  %v560_v38 = vsub.f32 %v429_v59, %v544_v36  ;;  %v561_v39 = vsub.f32 %v476_v63, %v547_v37 }
 0x4a8   :  { %v571_v40 = vmul.f32 1.442695, %v560_v38  ;;  %v573_v41 = vmul.f32 1.442695, %v561_v39 }
 0x4a9   :  { %v553_v42 = vpop.xlane.xlu1 %552  ;;  %v550_v13 = vpop.xlane.xlu0 %549 }
 0x4aa   :  { %1469 = vpow2.f32 %v571_v40  ;;  %v563_v43 = vsub.f32 %v526_v6, %v553_v42  ;;  %v562_v44 = vsub.f32 %v479_v7, %v550_v13  ;;  %v813_v7 = vpack.c.bf16 %v1645_v14, %v1645_v14 }
 0x4ab   :  { %1471 = vpow2.f32 %v573_v41 }
 0x4ac   :  { %v577_v45 = vmul.f32 1.442695, %v563_v43  ;;  %v575_v46 = vmul.f32 1.442695, %v562_v44  ;;  %v1464_v47 = vpop.eup %1463 }
 0x4ad   :  { %v626_v48 = vpop.permute.xlu1 %625  ;;  %v556_v49 = vpop.xlane.xlu0 %555  ;;  %v581_v51 = vsel %vm532_vm7, %v1464_v47, 0.0 }
 0x4ae   :  { %1473 = vpow2.f32 %v577_v45  ;;  %v564_v50 = vsub.f32 %v529_v12, %v556_v49  ;;  %1377 = vmatpush3.bf16.msra.mxu0 %v626_v48  ;;  %v1466_v52 = vpop.eup %1465  ;;  %582 = vadd.xlane.f32.xlu1 %v581_v51 }
 0x4af   :  { %1475 = vpow2.f32 %v575_v46  ;;  %1388 = vmatprep.subr.bf16.mxu0 %v1580_v17  ;;  %v587_v57 = vsel %vm532_vm7, %v1466_v52, 0.0 }
 0x4b0   :  { %v1468_v53 = vpop.eup %1467  ;;  %v579_v54 = vmul.f32 1.442695, %v564_v50 }
 0x4b1   :  { %v584_v55 = vsel %vm532_vm7, %v1468_v53, 0.0 }
 0x4b2   :  { %1477 = vpow2.f32 %v579_v54  ;;  %585 = vadd.xlane.f32.xlu0 %v584_v55  ;;  %588 = vadd.xlane.f32.xlu1 %v587_v57 }
 0x4b4   :  { %v1470_v59 = vpop.eup %1469 }
 0x4b5   :  { %v1749_v60 = vpop.eup %1471  ;;  %v590_v61 = vsel %vm532_vm7, %v1470_v59, 0.0 }
 0x4b6   :  { %v593_v62 = vsel %vm532_vm7, %v1749_v60, 0.0  ;;  %591 = vadd.xlane.f32.xlu0 %v590_v61 }
 0x4b7   :  { %594 = vadd.xlane.f32.xlu1 %v593_v62 }
 0x4b8   :  { %v1754_v63 = vpop.eup %1473 }
 0x4b9   :  { %v1476_v2 = vpop.eup %1475  ;;  %v599_v3 = vsel %vm532_vm7, %v1754_v63, 0.0 }
 0x4ba   :  { %v596_v4 = vsel %vm532_vm7, %v1476_v2, 0.0 }
 0x4bb   :  { %600 = vadd.xlane.f32.xlu1 %v599_v3  ;;  %597 = vadd.xlane.f32.xlu0 %v596_v4 }
 0x4bc   :  { %v1759_v5 = vpop.eup %1477 }
 0x4bd   :  { %v602_v6 = vsel %vm532_vm7, %v1759_v5, 0.0 }
 0x4bf   :  { %603 = vadd.xlane.f32.xlu0 %v602_v6 }
 0x4cc   :  { %719 = vrot.lane.b32.xlu1 %v1702_v30, %s1583_s7  ;;  %v816_v30 = vpack.c.bf16 %v1676_v58, %v1676_v58 }
 0x4d0   :  { %766 = vrot.lane.b32.xlu1 %v1704_v31, %s1583_s7 }
 0x4d4   :  { %820 = vrot.lane.b32.xlu1 %v814_v8, %s1584_s8 }
 0x4d5   :  { %672 = vrot.lane.b32.xlu0 %v1698_v15, %s1583_s7 }
 0x4d8   :  { %922 = vrot.lane.b32.xlu1 %v815_v9, %s1584_s8 }
 0x4d9   :  { %871 = vrot.lane.b32.xlu0 %v813_v7, %s1584_s8 }
 0x4dd   :  { %975 = vrot.lane.b32.xlu0 %v816_v30, %s1584_s8 }
 0x53b   :  { %v583_v31 = vpop.xlane.xlu1 %582 }
 0x53c   :  { %1479 = vrcp.f32 %v583_v31 }
 0x53f   :  { %v586_v15 = vpop.xlane.xlu0 %585  ;;  %v589_v10 = vpop.xlane.xlu1 %588 }
 0x540   :  { %1481 = vrcp.f32 %v586_v15 }
 0x541   :  { %1483 = vrcp.f32 %v589_v10 }
 0x543   :  { %v592_v14 = vpop.xlane.xlu0 %591 }
 0x544   :  { %v595_v11 = vpop.xlane.xlu1 %594  ;;  %1485 = vrcp.f32 %v592_v14 }
 0x545   :  { %1487 = vrcp.f32 %v595_v11 }
 0x546   :  { %v1480_v16 = vpop.eup %1479 }
 0x547   :  { %v613_v56 = vmul.f32 %v1480_v16, %v1464_v47 }
 0x548   :  { %v601_v12 = vpop.xlane.xlu1 %600  ;;  %v598_v19 = vpop.xlane.xlu0 %597 }
 0x549   :  { %1489 = vrcp.f32 %v598_v19 }
 0x54a   :  { %v1482_v20 = vpop.eup %1481  ;;  %1491 = vrcp.f32 %v601_v12 }
 0x54b   :  { %v614_v21 = vmul.f32 %v1482_v20, %v1468_v53  ;;  %v1484_v58 = vpop.eup %1483 }
 0x54c   :  { %v604_v23 = vpop.xlane.xlu0 %603  ;;  %v720_v28 = vpop.permute.xlu1 %719  ;;  %v615_v29 = vmul.f32 %v1484_v58, %v1466_v52 }
 0x54d   :  { %1493 = vrcp.f32 %v604_v23  ;;  %v621_v24 = vpack.c.bf16 %v614_v21, %v613_v56 }
 0x54e   :  { %v1486_v27 = vpop.eup %1485 }
 0x54f   :  { %v616_v32 = vmul.f32 %v1486_v27, %v1470_v59  ;;  %1379 = vmatmul.mubr.msk.bf16.vlgmr.msra.gmra.mrb[16].mxu0 %vm532_vm7, %v621_v24  ;;  %v1488_v35 = vpop.eup %1487 }
 0x550   :  { %1389 = vmatpush3.bf16.msra.mxu0 %v720_v28  ;;  %v673_v33 = vpop.permute.xlu0 %672  ;;  %1390 = vmatprep.mubr.msk.bf16.mxu0 %vm1581_vm1, %v1580_v17  ;;  %v767_v37 = vpop.permute.xlu1 %766  ;;  %v617_v39 = vmul.f32 %v1488_v35, %v1749_v60 }
 0x551   :  { %1383 = vmatpush3.bf16.msra.mxu1 %v673_v33  ;;  %v622_v34 = vpack.c.bf16 %v616_v32, %v615_v29  ;;  %1400 = vmatprep.subr.bf16.mxu0 %v1580_v17 }
 0x552   :  { %1394 = vmatprep.subr.bf16.mxu1 %v1580_v17 }
 0x553   :  { %v1490_v36 = vpop.eup %1489 }
 0x554   :  { %1385 = vmatmul.mubr.msk.bf16.vlgmr.msra.gmra.mrb[16].mxu1 %vm532_vm7, %v622_v34  ;;  %v1492_v38 = vpop.eup %1491  ;;  %v618_v40 = vmul.f32 %v1490_v36, %v1476_v2  ;;  %v872_v13 = vpop.permute.xlu0 %871 }
 0x555   :  { %1395 = vmatpush3.bf16.msra.mxu1 %v767_v37  ;;  %1396 = vmatprep.mubr.msk.bf16.mxu1 %vm1581_vm1, %v1580_v17  ;;  %v619_v43 = vmul.f32 %v1492_v38, %v1754_v63  ;;  %v877_v46 = vsel %vm825_vm8, %v872_v13, 0  ;;  %v821_v47 = vpop.permute.xlu1 %820 }
 0x556   :  { %1406 = vmatprep.subr.bf16.mxu1 %v1580_v17  ;;  %v623_v42 = vpack.c.bf16 %v618_v40, %v617_v39  ;;  %v827_v48 = vsel %vm825_vm8, %v821_v47, 0 }
 0x557   :  { %v1494_v41 = vpop.eup %1493 }
 0x558   :  { %v620_v44 = vmul.f32 %v1494_v41, %v1759_v5  ;;  %1391 = vmatmul.mubr.msk.bf16.vlgmr.msra.gmra.mrb[20].mxu0 %vm532_vm7, %v623_v42  ;;  %v976_v50 = vpop.permute.xlu0 %975 }
 0x559   :  { %1402 = vmatprep.mubr.msk.bf16.mxu0 %vm1581_vm1, %v1580_v17  ;;  %1401 = vmatpush3.bf16.msra.mxu0 %v827_v48  ;;  %v981_v55 = vsel %vm825_vm8, %v976_v50, 0  ;;  %v923_v59 = vpop.permute.xlu1 %922 }
 0x55a   :  { %v624_v45 = vpack.c.bf16 %v620_v44, %v619_v43  ;;  %1412 = vmatprep.subr.bf16.mxu0 %v1580_v17  ;;  %v928_v2 = vsel %vm825_vm8, %v923_v59, 0 }
 0x55c   :  { %1397 = vmatmul.mubr.msk.bf16.vlgmr.msra.gmra.mrb[20].mxu1 %vm532_vm7, %v624_v45 }
 0x55d   :  { %1407 = vmatpush3.bf16.msra.mxu1 %v877_v46  ;;  %1408 = vmatprep.mubr.msk.bf16.mxu1 %vm1581_vm1, %v1580_v17 }
 0x55e   :  { %1418 = vmatprep.subr.bf16.mxu1 %v1580_v17 }
 0x622   :  { %v665_v49 = vpop.f32.mrb[16].mxu0 }
 0x623   :  { %v1380_v51 = vpop.f32.mrb[17].mxu0 }
 0x624   :  { %v668_v52 = vpop.f32.mrb[18].mxu0 }
 0x625   :  { %v817_v53 = vpack.c.bf16 %v668_v52, %v665_v49  ;;  %v1381_v54 = vpop.f32.mrb[19].mxu0 }
 0x627   :  { %v712_v57 = vpop.f32.mrb[16].mxu1  ;;  %1409 = vmatmul.mubr.msk.bf16.vlgmr.msra.gmra.mrb[24].mxu1 %vm334_vm6, %v817_v53 }
 0x628   :  { %v1386_v60 = vpop.f32.mrb[17].mxu1  ;;  %1419 = vmatpush3.bf16.msra.mxu1 %v981_v55  ;;  %1420 = vmatprep.mubr.msk.bf16.mxu1 %vm1581_vm1, %v1580_v17 }
 0x629   :  { %v715_v61 = vpop.f32.mrb[18].mxu1  ;;  %1432 = vmatprep.subr.bf16.mxu1 %v1580_v17 }
 0x62a   :  { %v818_v62 = vpack.c.bf16 %v715_v61, %v712_v57  ;;  %v1387_v63 = vpop.f32.mrb[19].mxu1 }
 0x62b   :  { %v759_v3 = vpop.f32.mrb[20].mxu0 }
 0x62c   :  { %1403 = vmatmul.mubr.msk.bf16.vlgmr.msra.gmra.mrb[24].mxu0 %vm334_vm6, %v818_v62  ;;  %v1392_v4 = vpop.f32.mrb[21].mxu0 }
 0x62d   :  { %1413 = vmatpush3.bf16.msra.mxu0 %v928_v2  ;;  %1414 = vmatprep.mubr.msk.bf16.mxu0 %vm1581_vm1, %v1580_v17  ;;  %v762_v5 = vpop.f32.mrb[22].mxu0 }
 0x62e   :  { %1424 = vmatprep.subr.bf16.mxu0 %v1580_v17  ;;  %v920_v6 = vpack.c.bf16 %v762_v5, %v759_v3  ;;  %v1393_v7 = vpop.f32.mrb[23].mxu0 }
 0x62f   :  { %v806_v8 = vpop.f32.mrb[20].mxu1  ;;  %v1270_v7 = vld [vmem:[#allocation5 + $0x82] ss:$0 sm:$0xff] }
 0x630   :  { %v1398_v9 = vpop.f32.mrb[21].mxu1 }
 0x631   :  { %v809_v30 = vpop.f32.mrb[22].mxu1  ;;  %v65_v9 = vld [vmem:[#allocation5 + $0x68] sm:$0xff] }
 0x632   :  { %v973_v31 = vpack.c.bf16 %v809_v30, %v806_v8  ;;  %v1399_v15 = vpop.f32.mrb[23].mxu1  ;;  %v64_v8 = vld [vmem:[#allocation5 + $0x60] sm:$0xff] }
 0x633   :  { %v66_v15 = vld [vmem:[#allocation5 + $0x70] sm:$0xff] }
 0x634   :  { %1415 = vmatmul.mubr.msk.bf16.vlgmr.msra.gmra.mrb[28].mxu0 %vm334_vm6, %v920_v6  ;;  %1421 = vmatmul.mubr.msk.bf16.vlgmr.msra.gmra.mrb[28].mxu1 %vm334_vm6, %v973_v31  ;;  %v1157_v31 = vpack.c.bf16 %v65_v9, %v64_v8 }
 0x635   :  { %1428 = vmatprep.mubr.msk.bf16.mxu0 %vm1581_vm1, %v1580_v17  ;;  %1440 = vmatprep.mubr.msk.bf16.mxu1 %vm1581_vm1, %v1580_v17 }
 0x6fa   :  { %v913_v10 = vpop.f32.mrb[24].mxu1 }
 0x6fb   :  { %v1410_v14 = vpop.f32.mrb[25].mxu1 }
 0x6fc   :  { %v916_v11 = vpop.f32.mrb[26].mxu1 }
 0x6fd   :  { %v1411_v16 = vpop.f32.mrb[27].mxu1 }
 0x6ff   :  { %v863_v12 = vpop.f32.mrb[24].mxu0 }
 0x700   :  { %v914_v19 = vadd.f32 %v913_v10, %v863_v12  ;;  %v1404_v20 = vpop.f32.mrb[25].mxu0  ;;  %v67_v10 = vld [vmem:[#allocation5 + $0x78] sm:$0xff] }
 0x701   :  { %v866_v56 = vpop.f32.mrb[26].mxu0  ;;  %v1158_v16 = vpack.c.bf16 %v67_v10, %v66_v15 }
 0x702   :  { %v917_v21 = vadd.f32 %v916_v11, %v866_v56  ;;  %v1405_v58 = vpop.f32.mrb[27].mxu0  ;;  %v1271_v56 = vld [vmem:[#allocation5 + $0x83] ss:$0 sm:$0xff] }
 0x707   :  { %v964_v23 = vpop.f32.mrb[28].mxu0  ;;  %v1017_v24 = vpop.f32.mrb[28].mxu1 }
 0x708   :  { %v971_v27 = vadd.f32 %v964_v23, %v914_v19  ;;  %v1416_v28 = vpop.f32.mrb[29].mxu0  ;;  %v1422_v29 = vpop.f32.mrb[29].mxu1 }
 0x709   :  { %v967_v32 = vpop.f32.mrb[30].mxu0  ;;  %v1020_v33 = vpop.f32.mrb[30].mxu1 }
 0x70a   :  { %v1024_v34 = vadd.f32 %v1017_v24, %v971_v27  ;;  %v972_v35 = vadd.f32 %v967_v32, %v917_v21  ;;  %v1417_v36 = vpop.f32.mrb[31].mxu0  ;;  %v1423_v37 = vpop.f32.mrb[31].mxu1  ;;  %v1272_v27 = vld [vmem:[#allocation5 + $0x85] ss:$0 sm:$0xff] }
 0x70c   :  { %v1816_v38 = vadd.f32 %v1024_v34, %v1631_v0  ;;  %v1025_v39 = vadd.f32 %v1020_v33, %v972_v35  ;;  %v1274_v34 = vld [vmem:[#allocation5 + $0x84] ss:$0 sm:$0xff] }
 0x70e   :  { %v1819_v40 = vadd.f32 %v1025_v39, %v1633_v1  ;;  %v1028_v41 = vsel %vm78_vm0, %v1816_v38, 0.0 }
 0x70f   :  { %1029 = vadd.xlane.f32.xlu1 %v1028_v41 }
 0x710   :  { %v1031_v42 = vsel %vm78_vm0, %v1819_v40, 0.0 }
 0x711   :  { %1032 = vadd.xlane.f32.xlu0 %v1031_v42 }
 0x79c   :  { %v1030_v13 = vpop.xlane.xlu1 %1029 }
 0x79d   :  { %v1034_v43 = vmul.f32 0.03125, %v1030_v13 }
 0x79e   :  { %v1033_v44 = vpop.xlane.xlu0 %1032 }
 0x79f   :  { %v1036_v45 = vsub.f32 %v1816_v38, %v1034_v43  ;;  %v1035_v46 = vmul.f32 0.03125, %v1033_v44 }
 0x7a1   :  { %v1037_v0 = vsub.f32 %v1819_v40, %v1035_v46  ;;  %1072 = vrot.lane.b32.xlu1 %v1036_v45, %s1579_s1  ;;  %v1038_v1 = vmul.f32 %v1036_v45, %v1036_v45 }
 0x7a3   :  { %v1040_v47 = vsel %vm78_vm0, %v1038_v1, 0.0  ;;  %v1039_v48 = vmul.f32 %v1037_v0, %v1037_v0 }
 0x7a4   :  { %1041 = vadd.xlane.f32.xlu0 %v1040_v47 }
 0x7a5   :  { %1098 = vrot.lane.b32.xlu1 %v1652_v18, %s1579_s1  ;;  %v1043_v49 = vsel %vm78_vm0, %v1039_v48, 0.0 }
 0x7a8   :  { %1044 = vadd.xlane.f32.xlu0 %v1043_v49 }
 0x7a9   :  { %1100 = vrot.lane.b32.xlu1 %v1662_v25, %s1579_s1 }
 0x7be   :  { %1074 = vrot.lane.b32.xlu0 %v1037_v0, %s1579_s1 }
 0x7c2   :  { %1167 = vrot.lane.b32.xlu0 %v1655_v22, %s1579_s1 }
 0x7c6   :  { %1171 = vrot.lane.b32.xlu0 %v1157_v31, %s1579_s1 }
 0x7ca   :  { %1173 = vrot.lane.b32.xlu0 %v1158_v16, %s1579_s1 }
 0x813   :  { %v1073_v50 = vpop.permute.xlu1 %1072 }
 0x814   :  { %v1078_v11 = vmul.f32 %v1270_v7, %v1073_v50 }
 0x817   :  { %v1099_v51 = vpop.permute.xlu1 %1098 }
 0x818   :  { %1425 = vmatpush3.bf16.msra.mxu0 %v1099_v51 }
 0x819   :  { %1426 = vmatprep.subr.bf16.mxu0 %v1580_v17 }
 0x81b   :  { %v1101_v52 = vpop.permute.xlu1 %1100 }
 0x81c   :  { %1427 = vmatpush3.bf16.msra.mxu0 %v1101_v52 }
 0x831   :  { %v1042_v53 = vpop.xlane.xlu0 %1041 }
 0x832   :  { %v1046_v18 = vmul.f32 0.032258064, %v1042_v53 }
 0x834   :  { %1495 = vrsqrt.f32 %v1046_v18  ;;  %vm1050_vm9 = vcmp.eq.f32.partialorder %v1046_v18, inf  ;;  %v1053_v59 = vand.u32 2147483648, %v1046_v18  ;;  %vm1052_vm10 = vcmp.eq.f32.partialorder %v1046_v18, 0.0 }
 0x835   :  { %v1045_v54 = vpop.xlane.xlu0 %1044 }
 0x836   :  { %v1047_v55 = vmul.f32 0.032258064, %v1045_v54 }
 0x838   :  { %1497 = vrsqrt.f32 %v1047_v55  ;;  %vm1057_vm11 = vcmp.eq.f32.partialorder %v1047_v55, inf  ;;  %v1060_v2 = vand.u32 2147483648, %v1047_v55  ;;  %vm1059_vm12 = vcmp.eq.f32.partialorder %v1047_v55, 0.0 }
 0x839   :  { %v1075_v6 = vpop.permute.xlu0 %1074 }
 0x83a   :  { %v1079_v12 = vmul.f32 %v1270_v7, %v1075_v6 }
 0x83d   :  { %v1168_v30 = vpop.permute.xlu0 %1167 }
 0x83e   :  { %v1496_v57 = vpop.eup %1495  ;;  %1433 = vmatpush3.bf16.msra.mxu1 %v1168_v30 }
 0x83f   :  { %v1049_v25 = vmul.f32 %v1496_v57, %v1046_v18  ;;  %1434 = vmatprep.subr.bf16.mxu1 %v1580_v17 }
 0x841   :  { %v1051_v60 = vsel %vm1050_vm9, %v1046_v18, %v1049_v25  ;;  %v1172_v32 = vpop.permute.xlu0 %1171 }
 0x842   :  { %v1498_v22 = vpop.eup %1497  ;;  %v1054_v61 = vsel %vm1052_vm10, %v1053_v59, %v1051_v60 }
 0x843   :  { %v1056_v62 = vmul.f32 %v1498_v22, %v1047_v55  ;;  %v1062_v63 = vadd.f32 1e-06, %v1054_v61 }
 0x845   :  { %v1058_v3 = vsel %vm1057_vm11, %v1047_v55, %v1056_v62  ;;  %1499 = vrcp.f32 %v1062_v63  ;;  %v1174_v33 = vpop.permute.xlu0 %1173 }
 0x846   :  { %v1061_v4 = vsel %vm1059_vm12, %v1060_v2, %v1058_v3 }
 0x847   :  { %v1063_v5 = vadd.f32 1e-06, %v1061_v4 }
 0x849   :  { %1501 = vrcp.f32 %v1063_v5 }
 0x84f   :  { %v1500_v14 = vpop.eup %1499 }
 0x850   :  { %v1080_v19 = vmul.f32 %v1500_v14, %v1078_v11 }
 0x852   :  { %v1086_v23 = vadd.f32 %v1271_v56, %v1080_v19 }
 0x853   :  { %v1502_v20 = vpop.eup %1501 }
 0x854   :  { %v1081_v21 = vmul.f32 %v1502_v20, %v1079_v12 }
 0x856   :  { %v1087_v58 = vadd.f32 %v1271_v56, %v1081_v21 }
 0x858   :  { %v1088_v24 = vpack.c.bf16 %v1087_v58, %v1086_v23 }
 0x85a   :  { %1094 = vrot.lane.b32.xlu1 %v1088_v24, %s1579_s1 }
 0x85e   :  { %1169 = vrot.lane.b32.xlu1 %v1666_v26, %s1579_s1 }
 0x862   :  { %1105 = vrot.lane.b32.xlu1 %v1272_v27, %s1579_s1 }
 0x866   :  { %1180 = vrot.lane.b32.xlu1 %v1274_v34, %s1579_s1 }
 0x8cc   :  { %v1095_v28 = vpop.permute.xlu1 %1094 }
 0x8cd   :  { %1429 = vmatmul.mubr.msk.bf16.vlgmr.msra.gmra.mrb[32].mxu0 %vm78_vm0, %v1095_v28 }
 0x8d0   :  { %v1170_v29 = vpop.permute.xlu1 %1169 }
 0x8d1   :  { %1435 = vmatpush3.bf16.msra.mxu1 %v1170_v29 }
 0x8d2   :  { %1436 = vmatprep.subr.bf16.mxu1 %v1580_v17 }
 0x8d4   :  { %v1106_v26 = vpop.permute.xlu1 %1105 }
 0x8d5   :  { %1437 = vmatpush3.bf16.msra.mxu1 %v1172_v32 }
 0x8d6   :  { %1438 = vmatprep.subr.bf16.mxu1 %v1580_v17 }
 0x8d8   :  { %v1181_v45 = vpop.permute.xlu1 %1180 }
 0x8d9   :  { %1439 = vmatpush3.bf16.msra.mxu1 %v1174_v33 }
 0x9a0   :  { %v1145_v35 = vpop.f32.mrb[32].mxu0 }
 0x9a1   :  { %v1146_v36 = vadd.f32 %v1145_v35, %v1106_v26  ;;  %v1430_v37 = vpop.f32.mrb[33].mxu0 }
 0x9a2   :  { %v1148_v39 = vpop.f32.mrb[34].mxu0 }
 0x9a3   :  { %v1149_v41 = vadd.f32 %v1148_v39, %v1106_v26  ;;  %v1431_v42 = vpop.f32.mrb[35].mxu0  ;;  %v1152_v13 = vmax.f32 %v1146_v36, 0.0 }
 0x9a5   :  { %v1153_v43 = vmax.f32 %v1149_v41, 0.0 }
 0x9a7   :  { %v1154_v44 = vpack.c.bf16 %v1153_v43, %v1152_v13 }
 0x9a9   :  { %1441 = vmatmul.mubr.msk.bf16.vlgmr.msra.gmra.mrb[32].mxu1 %vm1183_vm13, %v1154_v44 }
 0xa7c   :  { %v1221_v46 = vpop.f32.mrb[32].mxu1 }
 0xa7d   :  { %v1222_v17 = vadd.f32 %v1221_v46, %v1181_v45  ;;  %v1442_v0 = vpop.f32.mrb[33].mxu1 }
 0xa7e   :  { %v1224_v1 = vpop.f32.mrb[34].mxu1 }
 0xa7f   :  { %v1228_v47 = vmax.f32 %v1222_v17, 0.0  ;;  %v1225_v48 = vadd.f32 %v1224_v1, %v1181_v45  ;;  %v1443_v49 = vpop.f32.mrb[35].mxu1 }
 0xa81   :  { %v1230_v50 = vadd.f32 %v1228_v47, %v1816_v38  ;;  %v1229_v51 = vmax.f32 %v1225_v48, 0.0 }
 0xa83   :  { %1232 = vst.msk [vmem:[#allocation7] sm:$0xff] %vm78_vm0, %v1230_v50  ;;  %v1231_v52 = vadd.f32 %v1229_v51, %v1819_v40 }
 0xa85   :  { %1233 = vst.msk [vmem:[#allocation7 + $0x8] sm:$0xff] %vm78_vm0, %v1231_v52 }
 0xa86   :  { %1558 = shalt.err (!%p1555_p6)
}
 0xa87   :  { %s1559_s14 = scalar_lea.hbm %s1870_s2, 256 }
 0xa88   :  { %p1560_p7 = scmp.ne.s32.totalorder %s1870_s2, %s1559_s14  ;;  %p1563_p8 = scmp.lt.u32.totalorder %s1559_s14, %s1870_s2 }
 0xa8a   :  { %p1565_p9 = pnand %p1563_p8, %p1560_p7 }
 0xa8c   :  { %1568 = shalt.err (!%p1565_p9)
}
 0xa8d   :  { %1245 = dma.vmem_to_hbm [thread:$0]  %s1240_s10, 256, %s1870_s2, [#allocation4], %s1576_s19, %s1576_s19, %s1577_s20  }
 0xa8e   :  { %1573 = dma.done.wait [#allocation4], 256  }
 0xa8f   :  { %1574 = vsyncadd [#allocation4], 4294967040 }
 0xa90   :  { %1249 = vsyncpa [#allocation3], 1 }
 0xa91   :  { %1250 = vsyncpa [#allocation6], 1 }
 0xa92   :  { %1251 = vsyncpa [#allocation4], 1 }

</bundles_post_ra>
